<compile_context>
chip_gen: v7x
topology: tpu7x:2x2x1
jax: 0.10.0
libtpu: 0.0.40
codegen_flags: <defaults>
</compile_context>

<pallas_src>
import jax
import jax.numpy as jnp
from jax.experimental import pallas as pl
from jax.experimental.pallas import tpu as pltpu

IN_DIM = 28 * 28   # 784
HID_DIM = 100
OUT_DIM = 10

HID_PAD = 128      # 100 -> 128 (full MXU / lane width)
OUT_PAD = 128      # 10  -> 128 (lane-dense output stores)

TB_MAX = 1024      # max batch tile (rows) per grid step


def _round_up(x: int, m: int) -> int:
    return ((x + m - 1) // m) * m


def _cdiv(a: int, b: int) -> int:
    return (a + b - 1) // b


def _pick_batch_tile(b: int) -> int:
    """Choose the per-step batch tile (static, shapes are known under jit)."""
    if b <= 256:
        # Single block covering the whole (small) batch: block dim == array
        # dim is always legal, and there is no padding / partial block.
        return b
    if b <= 2 * TB_MAX:
        # Split into >= 2 tiles so the "parallel" grid axis gives both v7x
        # TensorCores work (no-op on v5e/v6e).  Multiple of 16 keeps the
        # in-kernel bf16 activations nicely packed.
        return _round_up(_cdiv(b, 2), 16)
    return TB_MAX


def _fc_mlp_kernel(x_ref, w1_ref, w2_ref, o_ref):
    # x_ref : (TB, 784)   f32  (cast to bf16 in-kernel, hidden under the DMA)
    # w1_ref: (784, 128)  bf16 (resident across the whole grid)
    # w2_ref: (128, 128)  bf16 (resident across the whole grid)
    # o_ref : (TB, 128)   bf16 (lane-dense store; cols 10..127 are zero pad)
    x = x_ref[...].astype(jnp.bfloat16)
    h = jnp.dot(x, w1_ref[...], preferred_element_type=jnp.float32)
    h = jnp.maximum(h, 0.0)                                    # relu(fc1(x))
    y = jnp.dot(h.astype(jnp.bfloat16), w2_ref[...],
                preferred_element_type=jnp.float32)
    o_ref[...] = jnp.maximum(y, 0.0).astype(jnp.bfloat16)      # relu(fc2(x))


def prepare_fc_weights(w1, w2):
    """One-time weight prep (hoisted out of the per-call path).

    w1: (100, 784) PyTorch nn.Linear layout (out, in)
    w2: (10, 100)
    returns (w1_t, w2_t) = ((784, 128), (128, 128)) bf16, zero-padded,
    laid out (in, out) so the kernel computes plain x @ W.
    """
    w1_t = jnp.zeros((IN_DIM, HID_PAD), jnp.float32)
    w1_t = w1_t.at[:, :HID_DIM].set(jnp.asarray(w1, jnp.float32).T)
    w2_t = jnp.zeros((HID_PAD, OUT_PAD), jnp.float32)
    w2_t = w2_t.at[:HID_DIM, :OUT_DIM].set(jnp.asarray(w2, jnp.float32).T)
    return w1_t.astype(jnp.bfloat16), w2_t.astype(jnp.bfloat16)


@jax.jit
def fc_model_forward(x, w1_t, w2_t):
    """Equivalent of FCModel.forward.

    x    : any f32 array whose trailing elements are a multiple of 784
           (e.g. (B, 1, 28, 28))
    w1_t : (784, 128) bf16 from prepare_fc_weights
    w2_t : (128, 128) bf16 from prepare_fc_weights
    returns (B, 10) float32
    """
    x2d = x.reshape(-1, IN_DIM)                     # x.view(-1, 28*28), no copy
    b = x2d.shape[0]

    tb = _pick_batch_tile(b)
    grid = (_cdiv(b, tb),)

    flops = 2 * b * (IN_DIM * HID_PAD + HID_PAD * OUT_PAD)
    bytes_accessed = (b * IN_DIM * 4                # x   (f32, read once)
                      + IN_DIM * HID_PAD * 2        # W1  (bf16)
                      + HID_PAD * OUT_PAD * 2       # W2  (bf16)
                      + b * OUT_PAD * 2)            # out (bf16)

    out = pl.pallas_call(
        _fc_mlp_kernel,
        out_shape=jax.ShapeDtypeStruct((b, OUT_PAD), jnp.bfloat16),
        grid=grid,
        in_specs=[
            pl.BlockSpec((tb, IN_DIM), lambda i: (i, 0)),        # x tile
            pl.BlockSpec((IN_DIM, HID_PAD), lambda i: (0, 0)),   # W1 (resident)
            pl.BlockSpec((HID_PAD, OUT_PAD), lambda i: (0, 0)),  # W2 (resident)
        ],
        out_specs=pl.BlockSpec((tb, OUT_PAD), lambda i: (i, 0)),
        compiler_params=pltpu.CompilerParams(
            dimension_semantics=("parallel",)),
        cost_estimate=pl.CostEstimate(
            flops=flops, transcendentals=0, bytes_accessed=bytes_accessed),
    )(x2d, w1_t, w2_t)

    # Slice away the 10 -> 128 output padding and upcast the bf16 logits.
    return out[:, :OUT_DIM].astype(jnp.float32)


if __name__ == "__main__":
    key = jax.random.PRNGKey(0)
    kx, k1, k2 = jax.random.split(key, 3)

    # Small deterministic example: batch=2 MNIST-like images, NCHW (2,1,28,28).
    x = jax.random.normal(kx, (2, 1, 28, 28), dtype=jnp.float32)

    # Deterministic weight init mimicking nn.Linear default (+/- 1/sqrt(fan_in)).
    bound1 = 1.0 / jnp.sqrt(jnp.float32(IN_DIM))
    bound2 = 1.0 / jnp.sqrt(jnp.float32(HID_DIM))
    w1 = jax.random.uniform(k1, (HID_DIM, IN_DIM), jnp.float32, -bound1, bound1)
    w2 = jax.random.uniform(k2, (OUT_DIM, HID_DIM), jnp.float32, -bound2, bound2)

    w1_t, w2_t = prepare_fc_weights(w1, w2)          # one-time weight prep
    out = fc_model_forward(x, w1_t, w2_t)
    out = jax.block_until_ready(out)
    assert out.shape == (2, OUT_DIM)

    # Reference 1: identical bf16 dtype path in plain JAX (tight tolerance;
    # the extra bf16 rounding on the output adds only ~1e-3 on these logits).
    x_bf = x.reshape(-1, IN_DIM).astype(jnp.bfloat16)
    h_ref = jnp.maximum(
        jnp.dot(x_bf, w1.astype(jnp.bfloat16).T,
                preferred_element_type=jnp.float32), 0.0)
    ref_bf = jnp.maximum(
        jnp.dot(h_ref.astype(jnp.bfloat16), w2.astype(jnp.bfloat16).T,
                preferred_element_type=jnp.float32), 0.0)
    assert jnp.allclose(out, ref_bf, atol=1e-2, rtol=1e-2)

    # Reference 2: full f32 math (loose tolerance — bf16 weights/activations).
    ref_f32 = jnp.maximum(
        jnp.maximum(x.reshape(-1, IN_DIM) @ w1.T, 0.0) @ w2.T, 0.0)
    assert jnp.allclose(out, ref_f32, atol=5e-2, rtol=5e-2)

    print("KERNEL_OK")
</pallas_src>

<mosaic_0001>
module attributes {stable_mosaic.version = 11 : i64} {
  func.func @_fc_mlp_kernel(%arg0: i32, %arg1: memref<2x784xf32, #tpu.memory_space<vmem>>, %arg2: memref<784x128xbf16, #tpu.memory_space<vmem>>, %arg3: memref<128x128xbf16, #tpu.memory_space<vmem>>, %arg4: memref<2x128xbf16, #tpu.memory_space<vmem>>) attributes {dimension_semantics = [#tpu.dimension_semantics<parallel>], iteration_bounds = array<i64: 1>, scalar_prefetch = 0 : i64, scratch_operands = 0 : i64, tpu.core_type = #tpu.core_type<tc>, window_params = [{transform_indices = @transform_0, window_bounds = array<i64: 2, 784>}, {pipeline_mode = #tpu.pipeline_mode<synchronous>, transform_indices = @transform_1, window_bounds = array<i64: 784, 128>}, {pipeline_mode = #tpu.pipeline_mode<synchronous>, transform_indices = @transform_2, window_bounds = array<i64: 128, 128>}, {transform_indices = @transform_3, window_bounds = array<i64: 2, 128>}]} {
    %c0 = arith.constant 0 : index
    %c0_0 = arith.constant 0 : index
    %0 = vector.load %arg1[%c0, %c0_0] : memref<2x784xf32, #tpu.memory_space<vmem>>, vector<2x784xf32>
    %1 = arith.truncf %0 : vector<2x784xf32> to vector<2x784xbf16>
    %c0_1 = arith.constant 0 : index
    %c0_2 = arith.constant 0 : index
    %2 = vector.load %arg2[%c0_1, %c0_2] : memref<784x128xbf16, #tpu.memory_space<vmem>>, vector<784x128xbf16>
    %cst = arith.constant dense<0.000000e+00> : vector<2x128xf32>
    %3 = tpu.matmul %1, %2, %cst {dimension_numbers = #tpu.dot_dimension_numbers<[1], [0], [0], [1], [0, 0, 1, 1], [], []>} : vector<2x784xbf16>, vector<784x128xbf16>, vector<2x128xf32> -> vector<2x128xf32>
    %cst_3 = arith.constant 0.000000e+00 : f32
    %4 = vector.broadcast %cst_3 : f32 to vector<2x128xf32>
    %5 = arith.maximumf %3, %4 : vector<2x128xf32>
    %6 = arith.truncf %5 : vector<2x128xf32> to vector<2x128xbf16>
    %c0_4 = arith.constant 0 : index
    %c0_5 = arith.constant 0 : index
    %7 = vector.load %arg3[%c0_4, %c0_5] : memref<128x128xbf16, #tpu.memory_space<vmem>>, vector<128x128xbf16>
    %cst_6 = arith.constant dense<0.000000e+00> : vector<2x128xf32>
    %8 = tpu.matmul %6, %7, %cst_6 {dimension_numbers = #tpu.dot_dimension_numbers<[1], [0], [0], [1], [0, 0, 1, 1], [], []>} : vector<2x128xbf16>, vector<128x128xbf16>, vector<2x128xf32> -> vector<2x128xf32>
    %cst_7 = arith.constant 0.000000e+00 : f32
    %9 = vector.broadcast %cst_7 : f32 to vector<2x128xf32>
    %10 = arith.maximumf %8, %9 : vector<2x128xf32>
    %11 = arith.truncf %10 : vector<2x128xf32> to vector<2x128xbf16>
    %c0_8 = arith.constant 0 : index
    %c0_9 = arith.constant 0 : index
    %12 = vector.load %arg4[%c0_8, %c0_9] : memref<2x128xbf16, #tpu.memory_space<vmem>>, vector<2x128xbf16>
    tpu.vector_store %arg4[%c0_8, %c0_9], %11 {strides = array<i32>} : memref<2x128xbf16, #tpu.memory_space<vmem>>, vector<2x128xbf16>,
    return
  }
  func.func @transform_0(%arg0: i32) -> (i32, i32) {
    %c0_i32 = arith.constant 0 : i32
    %c0_i32_0 = arith.constant 0 : i32
    return %arg0, %c0_i32 : i32, i32
  }
  func.func @transform_1(%arg0: i32) -> (i32, i32) {
    %c0_i32 = arith.constant 0 : i32
    %c0_i32_0 = arith.constant 0 : i32
    %c0_i32_1 = arith.constant 0 : i32
    return %c0_i32, %c0_i32_0 : i32, i32
  }
  func.func @transform_2(%arg0: i32) -> (i32, i32) {
    %c0_i32 = arith.constant 0 : i32
    %c0_i32_0 = arith.constant 0 : i32
    %c0_i32_1 = arith.constant 0 : i32
    return %c0_i32, %c0_i32_0 : i32, i32
  }
  func.func @transform_3(%arg0: i32) -> (i32, i32) {
    %c0_i32 = arith.constant 0 : i32
    %c0_i32_0 = arith.constant 0 : i32
    return %arg0, %c0_i32 : i32, i32
  }
}

</mosaic_0001>

<bundles_post_ra>
// kernel: fc_model_forward.1
= control target key start
LH: loop header
LB: loop body
LE: loop exit
PB: predicated region body
PF: predicated region fallthrough
CT: control target
= control target key end

     0   :  { %8 = vsyncpa [#allocation3], 0  ;;  %s1000_s12 = smov [#allocation2]   ;;  %s1084_s0 = inlined_call_operand.vmem [shape: f32[2,784], index: 0, kind: input, shape index: {}]   ;;  %s1085_s1 = inlined_call_operand.hbm [shape: bf16[784,128], index: 1, kind: input, shape index: {}]   ;;  %s1086_s2 = inlined_call_operand.vmem [shape: bf16[128,128], index: 2, kind: input, shape index: {}]   ;;  %s1087_s3 = inlined_call_operand.vmem [shape: bf16[2,128], index: 3, kind: output, shape index: {}]  }
   0x1   :  { %s16_s13 = sshll.u32 %s1000_s12, 4  ;;  %s976_s16 = scalar_lea.hbm %s1085_s1, 6272  ;;  %s17_s13 = int_to_ptr.vmem [resolvable:$true] %s16_s13 }
   0x2   :  { %p977_p0 = scmp.ne.s32.totalorder %s1085_s1, %s976_s16  ;;  %p980_p1 = scmp.lt.u32.totalorder %s976_s16, %s1085_s1 }
   0x4   :  { %p982_p2 = pnand %p980_p1, %p977_p0 }
   0x6   :  { %985 = shalt.err (!%p982_p2)
}
   0x7   :  { %s986_s21 = scalar_lea.vmem %s17_s13, 6272  ;;  %p991_p4 = scmp.lt.s32.totalorder %s17_s13, %s17_s13 }
   0x8   :  { %p987_p3 = scmp.ne.s32.totalorder %s17_s13, %s986_s21  ;;  %p992_p5 = scmp.lt.s32.totalorder %s986_s21, %s986_s21 }
   0xa   :  { %p993_p6 = por %p992_p5, %p991_p4 }
   0xc   :  { %p994_p7 = pnand %p993_p6, %p987_p3 }
   0xe   :  { %997 = shalt.err (!%p994_p7)
}
   0xf   :  { %s1001_s22 = smov 64   ;;  %s1002_s23 = smov 4  }
  0x10   :  { %22 = dma.hbm_to_vmem [thread:$0]  %s1085_s1, 6272, %s17_s13, [#allocation3], %s1001_s22, %s1001_s22, %s1002_s23  }
  0x11   :  { %998 = dma.done.wait [#allocation3], 6272  }
  0x12   :  { %999 = vsyncadd [#allocation3], 4294961024  ;;  %v917_v0 = vld [vmem:[#allocation2 + $0x40] sm:$0xff]   ;;  %v921_v4 = vld [vmem:[#allocation2 + $0x48] sm:$0xff]   ;;  %v1003_v22 = vmov 1983009808   ;;  %v37_v24 = vlaneseq }
  0x13   :  { %v918_v1 = vld [vmem:[#allocation2 + $0xc0] sm:$0xff]   ;;  %808 = vmatprep.subr.bf16.mxu0 %v917_v0  ;;  %v922_v5 = vld [vmem:[#allocation2 + $0xc8] sm:$0xff]   ;;  %v925_v8 = vld [vmem:[#allocation2 + $0x50] sm:$0xff]   ;;  %v35_v23 = vunpack.c.l.s4 %v1003_v22  ;;  %v1004_v42 = vmov 0.0   ;;  %vm1005_vm0 = vmmov 0   ;;  %vm472_vm1 = vcmask 130048  }
  0x14   :  { %v919_v2 = vld [vmem:[#allocation2] sm:$0xff]   ;;  %830 = vmatprep.subr.bf16.mxu1 %v918_v1  ;;  %v923_v6 = vld [vmem:[#allocation2 + $0x8] sm:$0xff]   ;;  %v926_v9 = vld [vmem:[#allocation2 + $0xd0] sm:$0xff]   ;;  %v38_v30 = vshrl.u32 %v37_v24, 7 }
  0x15   :  { %v920_v3 = vld [vmem:[#allocation2 + $0x80] sm:$0xff]   ;;  %809 = vmatpush3.bf16.msra.mxu0 %v919_v2  ;;  %v924_v7 = vld [vmem:[#allocation2 + $0x88] sm:$0xff]   ;;  %v927_v10 = vld [vmem:[#allocation2 + $0x10] sm:$0xff]   ;;  %v36_v29 = vunpack.c.0.s8 %v35_v23 }
  0x16   :  { %831 = vmatpush3.bf16.msra.mxu1 %v920_v3  ;;  %810 = vmatprep.subr.bf16.mxu0 %v921_v4  ;;  %v928_v11 = vld [vmem:[#allocation2 + $0x90] sm:$0xff]   ;;  %v929_v12 = vld [vmem:[#allocation2 + $0x58] sm:$0xff]   ;;  %v933_v16 = vld [vmem:[#allocation2 + $0x60] sm:$0xff]  }
  0x17   :  { %832 = vmatprep.subr.bf16.mxu1 %v922_v5  ;;  %v930_v13 = vld [vmem:[#allocation2 + $0xd8] sm:$0xff]   ;;  %v934_v17 = vld [vmem:[#allocation2 + $0xe0] sm:$0xff]   ;;  %v937_v20 = vld [vmem:[#allocation2 + $0x68] sm:$0xff]   ;;  %v39_v35 = vsub.s32 %v36_v29, %v38_v30 }
  0x18   :  { %v931_v14 = vld [vmem:[#allocation2 + $0x18] sm:$0xff]   ;;  %v935_v18 = vld [vmem:[#allocation2 + $0x20] sm:$0xff]   ;;  %v938_v21 = vld [vmem:[#allocation2 + $0xe8] sm:$0xff]  }
  0x19   :  { %811 = vmatpush3.bf16.msra.mxu0 %v923_v6  ;;  %v932_v15 = vld [vmem:[#allocation2 + $0x98] sm:$0xff]   ;;  %v936_v19 = vld [vmem:[#allocation2 + $0xa0] sm:$0xff]   ;;  %v939_v25 = vld [vmem:[#allocation2 + $0x28] sm:$0xff]  }
  0x1a   :  { %833 = vmatpush3.bf16.msra.mxu1 %v924_v7  ;;  %812 = vmatprep.subr.bf16.mxu0 %v925_v8  ;;  %v940_v26 = vld [vmem:[#allocation2 + $0xa8] sm:$0xff]   ;;  %v941_v27 = vld [vmem:[#allocation2 + $0x70] sm:$0xff]   ;;  %v945_v33 = vld [vmem:[#allocation2 + $0x78] sm:$0xff]  }
  0x1b   :  { %834 = vmatprep.subr.bf16.mxu1 %v926_v9  ;;  %v942_v28 = vld [vmem:[#allocation2 + $0xf0] sm:$0xff]   ;;  %v946_v34 = vld [vmem:[#allocation2 + $0xf8] sm:$0xff]   ;;  %v29_v38 = vld [vmem:[%s1084_s0] sm:$0xff] }
  0x1c   :  { %v943_v31 = vld [vmem:[#allocation2 + $0x30] sm:$0xff]   ;;  %v947_v36 = vld [vmem:[#allocation2 + $0x38] sm:$0xff]   ;;  %v40_v39 = vrot.slane %v29_v38, %v39_v35  ;;  %v33_v40 = vcombine.high %v29_v38, %v29_v38  ;;  %v950_v41 = vld [vmem:[#allocation2 + $0x140] sm:$0xff]  }
  0x1d   :  { %813 = vmatpush3.bf16.msra.mxu0 %v927_v10  ;;  %v944_v32 = vld [vmem:[#allocation2 + $0xb0] sm:$0xff]   ;;  %v948_v37 = vld [vmem:[#allocation2 + $0xb8] sm:$0xff]   ;;  %v951_v48 = vld [vmem:[#allocation2 + $0x100] sm:$0xff]  }
  0x1e   :  { %835 = vmatpush3.bf16.msra.mxu1 %v928_v11  ;;  %814 = vmatprep.subr.bf16.mxu0 %v929_v12  ;;  %v48_v43 = vcombine.high %v40_v39, %v40_v39  ;;  %v47_v44 = vrot.slane %v33_v40, %v39_v35  ;;  %v73_v45 = vpack.c.bf16 %v40_v39, %v40_v39  ;;  %v952_v50 = vld [vmem:[#allocation2 + $0x148] sm:$0xff]   ;;  %v954_v53 = vld [vmem:[#allocation2 + $0x150] sm:$0xff]   ;;  %v956_v55 = vld [vmem:[#allocation2 + $0x158] sm:$0xff]  }
  0x1f   :  { %836 = vmatprep.subr.bf16.mxu1 %v930_v13  ;;  %v953_v52 = vld [vmem:[#allocation2 + $0x108] sm:$0xff]   ;;  %v955_v54 = vld [vmem:[#allocation2 + $0x110] sm:$0xff]   ;;  %v957_v56 = vld [vmem:[#allocation2 + $0x118] sm:$0xff]  }
  0x20   :  { %v74_v46 = vpack.c.bf16 %v48_v43, %v48_v43  ;;  %v49_v47 = vcombine.high %v47_v44, %v47_v44  ;;  %v75_v49 = vpack.c.bf16 %v47_v44, %v47_v44  ;;  %v958_v57 = vld [vmem:[#allocation2 + $0x160] sm:$0xff]   ;;  %v30_v59 = vld [vmem:[%s1084_s0 + $0x8] sm:$0x3f]  ;;  %v962_v5 = vld [vmem:[#allocation2 + $0x170] sm:$0xff]  }
  0x21   :  { %815 = vmatpush3.bf16.msra.mxu0 %v931_v14  ;;  %v966_v58 = vld [vmem:[#allocation2 + $0x180] sm:$0xff]   ;;  %v50_v60 = vcombine.high %v30_v59, %v30_v59  ;;  %v57_v61 = vrot.slane %v30_v59, %v39_v35  ;;  %v960_v63 = vld [vmem:[#allocation2 + $0x168] sm:$0xff]   ;;  %v963_v6 = vld [vmem:[#allocation2 + $0x130] sm:$0xff]  }
  0x22   :  { %837 = vmatpush3.bf16.msra.mxu1 %v932_v15  ;;  %816 = vmatprep.subr.bf16.mxu0 %v933_v16  ;;  %v76_v51 = vpack.c.bf16 %v49_v47, %v49_v47  ;;  %v959_v62 = vld [vmem:[#allocation2 + $0x120] sm:$0xff]   ;;  %v961_v4 = vld [vmem:[#allocation2 + $0x128] sm:$0xff]   ;;  %v964_v7 = vld [vmem:[#allocation2 + $0x178] sm:$0xff]  }
  0x23   :  { %838 = vmatprep.subr.bf16.mxu1 %v934_v17  ;;  %508 = vmatprep.mubr.bf16.mxu0 %v74_v46  ;;  %v64_v0 = vrot.slane %v50_v60, %v39_v35  ;;  %v65_v1 = vcombine.high %v57_v61, %v57_v61  ;;  %v965_v8 = vld [vmem:[#allocation2 + $0x138] sm:$0xff]   ;;  %v77_v9 = vpack.c.bf16 %v57_v61, %v57_v61  ;;  %v968_v10 = vld [vmem:[%s1086_s2] sm:$0xff]   ;;  %v969_v11 = vld [vmem:[%s1086_s2 + $0x8] sm:$0xff]  }
  0x24   :  { %548 = vmatprep.mubr.bf16.mxu1 %v76_v51  ;;  %v970_v12 = vld [vmem:[%s1086_s2 + $0x10] sm:$0xff]   ;;  %v971_v13 = vld [vmem:[%s1086_s2 + $0x18] sm:$0xff]   ;;  %v972_v14 = vld [vmem:[%s1086_s2 + $0x20] sm:$0xff]  }
  0x25   :  { %817 = vmatpush3.bf16.msra.mxu0 %v935_v18  ;;  %v78_v2 = vpack.c.bf16 %v65_v1, %v65_v1  ;;  %v79_v3 = vpack.c.bf16 %v64_v0, %v64_v0  ;;  %v973_v15 = vld [vmem:[%s1086_s2 + $0x28] sm:$0xff]   ;;  %v974_v16 = vld [vmem:[%s1086_s2 + $0x30] sm:$0xff]   ;;  %v975_v17 = vld [vmem:[%s1086_s2 + $0x38] sm:$0xff]  }
  0x26   :  { %839 = vmatpush3.bf16.msra.mxu1 %v936_v19  ;;  %818 = vmatprep.subr.bf16.mxu0 %v937_v20 }
  0x27   :  { %840 = vmatprep.subr.bf16.mxu1 %v938_v21 }
  0x29   :  { %819 = vmatpush3.bf16.msra.mxu0 %v939_v25 }
  0x2a   :  { %841 = vmatpush3.bf16.msra.mxu1 %v940_v26  ;;  %820 = vmatprep.subr.bf16.mxu0 %v941_v27 }
  0x2b   :  { %842 = vmatprep.subr.bf16.mxu1 %v942_v28 }
  0x2d   :  { %821 = vmatpush3.bf16.msra.mxu0 %v943_v31 }
  0x2e   :  { %843 = vmatpush3.bf16.msra.mxu1 %v944_v32  ;;  %822 = vmatprep.subr.bf16.mxu0 %v945_v33 }
  0x2f   :  { %844 = vmatprep.subr.bf16.mxu1 %v946_v34 }
  0x31   :  { %823 = vmatpush3.bf16.msra.mxu0 %v947_v36 }
  0x32   :  { %845 = vmatpush3.bf16.msra.mxu1 %v948_v37  ;;  %852 = vmatprep.subr.bf16.mxu0 %v950_v41 }
  0x33   :  { %885 = vmatprep.subr.bf16.mxu1 %v1004_v42 }
  0x34   :  { %509 = vmatmul.mubr.bf16.vlgmr.msra.gmra.mrb[0].mxu0 %v73_v45 }
  0x35   :  { %853 = vmatpush3.bf16.msra.mxu0 %v951_v48  ;;  %549 = vmatmul.mubr.bf16.vlgmr.msra.gmra.mrb[0].mxu1 %v75_v49 }
  0x36   :  { %854 = vmatprep.subr.bf16.mxu0 %v952_v50  ;;  %887 = vmatprep.mubr.msk.bf16.mxu1 %vm1005_vm0, %v1004_v42 }
  0x37   :  { %886 = vmatpush3.bf16.msra.mxu1 %v966_v58  ;;  %588 = vmatprep.mubr.bf16.mxu0 %v78_v2 }
  0x38   :  { %891 = vmatprep.subr.bf16.mxu1 %v1004_v42 }
  0x39   :  { %855 = vmatpush3.bf16.msra.mxu0 %v953_v52 }
  0x3a   :  { %856 = vmatprep.subr.bf16.mxu0 %v954_v53 }
  0x3d   :  { %857 = vmatpush3.bf16.msra.mxu0 %v955_v54  ;;  %888 = vmatmul.mubr.msk.bf16.vlgmr.msra.gmra.mrb[4].mxu1 %vm472_vm1, %v79_v3 }
  0x3e   :  { %858 = vmatprep.subr.bf16.mxu0 %v956_v55  ;;  %907 = vmatprep.mubr.msk.bf16.mxu1 %vm1005_vm0, %v1004_v42 }
  0x3f   :  { %892 = vmatpush3.bf16.msra.mxu1 %v968_v10 }
  0x40   :  { %893 = vmatprep.subr.bf16.mxu1 %v1004_v42 }
  0x41   :  { %859 = vmatpush3.bf16.msra.mxu0 %v957_v56 }
  0x42   :  { %860 = vmatprep.subr.bf16.mxu0 %v958_v57 }
  0x43   :  { %894 = vmatpush3.bf16.msra.mxu1 %v969_v11 }
  0x44   :  { %895 = vmatprep.subr.bf16.mxu1 %v1004_v42 }
  0x45   :  { %861 = vmatpush3.bf16.msra.mxu0 %v959_v62 }
  0x46   :  { %862 = vmatprep.subr.bf16.mxu0 %v960_v63 }
  0x47   :  { %896 = vmatpush3.bf16.msra.mxu1 %v970_v12 }
  0x48   :  { %897 = vmatprep.subr.bf16.mxu1 %v1004_v42 }
  0x49   :  { %863 = vmatpush3.bf16.msra.mxu0 %v961_v4 }
  0x4a   :  { %864 = vmatprep.subr.bf16.mxu0 %v962_v5 }
  0x4b   :  { %898 = vmatpush3.bf16.msra.mxu1 %v971_v13 }
  0x4c   :  { %899 = vmatprep.subr.bf16.mxu1 %v1004_v42 }
  0x4d   :  { %865 = vmatpush3.bf16.msra.mxu0 %v963_v6 }
  0x4e   :  { %866 = vmatprep.subr.bf16.mxu0 %v964_v7 }
  0x4f   :  { %900 = vmatpush3.bf16.msra.mxu1 %v972_v14 }
  0x50   :  { %901 = vmatprep.subr.bf16.mxu1 %v1004_v42 }
  0x51   :  { %867 = vmatpush3.bf16.msra.mxu0 %v965_v8 }
  0x53   :  { %902 = vmatpush3.bf16.msra.mxu1 %v973_v15 }
  0x54   :  { %589 = vmatmul.mubr.bf16.vlgmr.msra.gmra.mrb[4].mxu0 %v77_v9  ;;  %903 = vmatprep.subr.bf16.mxu1 %v1004_v42 }
  0x57   :  { %904 = vmatpush3.bf16.msra.mxu1 %v974_v16 }
  0x58   :  { %905 = vmatprep.subr.bf16.mxu1 %v1004_v42 }
  0x5b   :  { %906 = vmatpush3.bf16.msra.mxu1 %v975_v17 }
 0x107   :  { %v824_v18 = vpop.f32.mrb[0].mxu0 }
 0x108   :  { %v825_v19 = vpop.f32.mrb[1].mxu0  ;;  %v846_v20 = vpop.f32.mrb[0].mxu1 }
 0x109   :  { %v826_v21 = vadd.f32 %v825_v19, %v824_v18  ;;  %v827_v22 = vpop.f32.mrb[2].mxu0  ;;  %v847_v23 = vpop.f32.mrb[1].mxu1 }
 0x10a   :  { %v828_v24 = vpop.f32.mrb[3].mxu0  ;;  %v848_v25 = vadd.f32 %v847_v23, %v846_v20  ;;  %v849_v26 = vpop.f32.mrb[2].mxu1 }
 0x10b   :  { %v850_v27 = vpop.f32.mrb[3].mxu1 }
 0x10c   :  { %v551_v28 = vadd.f32 %v848_v25, %v826_v21 }
 0x110   :  { %v630_v29 = vpop.f32.mrb[4].mxu1 }
 0x111   :  { %v889_v30 = vpop.f32.mrb[5].mxu1 }
 0x112   :  { %v633_v31 = vpop.f32.mrb[6].mxu1 }
 0x113   :  { %v890_v32 = vpop.f32.mrb[7].mxu1 }
 0x127   :  { %v868_v33 = vpop.f32.mrb[4].mxu0 }
 0x128   :  { %v869_v34 = vpop.f32.mrb[5].mxu0 }
 0x129   :  { %v870_v35 = vadd.f32 %v869_v34, %v868_v33  ;;  %v871_v36 = vpop.f32.mrb[6].mxu0 }
 0x12a   :  { %v872_v37 = vpop.f32.mrb[7].mxu0 }
 0x12b   :  { %v591_v38 = vadd.f32 %v870_v35, %v551_v28 }
 0x12d   :  { %v631_v39 = vadd.f32 %v630_v29, %v591_v38 }
 0x12f   :  { %v636_v40 = vmax.f32 %v631_v39, 0.0 }
 0x131   :  { %v637_v41 = vpack.c.bf16 %v636_v40, %v636_v40 }
 0x133   :  { %908 = vmatmul.mubr.bf16.vlgmr.msra.gmra.mrb[8].mxu1 %v637_v41 }
 0x206   :  { %v736_v42 = vpop.f32.mrb[8].mxu1 }
 0x207   :  { %v742_v43 = vmax.f32 %v736_v42, 0.0  ;;  %v909_v44 = vpop.f32.mrb[9].mxu1 }
 0x208   :  { %v739_v45 = vpop.f32.mrb[10].mxu1 }
 0x209   :  { %v743_v46 = vpack.c.bf16 %v742_v43, %v742_v43  ;;  %v910_v47 = vpop.f32.mrb[11].mxu1 }
 0x20b   :  { %744 = vst [vmem:[%s1087_s3] sm:$0x1] %v743_v46 }
 0x20c   :  { %749 = vsyncpa [#allocation3], 1 }

</bundles_post_ra>
